<compile_context>
chip_gen: v5e
topology: v5e:2x2
jax: 0.10.0
libtpu: 0.0.40
codegen_flags: <defaults>
</compile_context>

<pallas_src>
import functools
import math

import jax
import jax.numpy as jnp
from jax import lax
from jax.experimental import pallas as pl
from jax.experimental.pallas import tpu as pltpu


# ----------------------------------------------------------------------------
# Interpolation matrices (PyTorch semantics: align_corners=False, half-pixel
# centers, src = (dst + 0.5) / scale - 0.5 clamped at 0; matches the default
# recompute_scale_factor=None/False path when scale_factor is given).
# ----------------------------------------------------------------------------
def _build_interp_matrix(out_size: int, in_size: int, scale_factor: float) -> jnp.ndarray:
    scale_inv = 1.0 / float(scale_factor)
    o = jnp.arange(out_size, dtype=jnp.float32)
    src = (o + 0.5) * scale_inv - 0.5
    src = jnp.maximum(src, 0.0)
    i0 = jnp.floor(src).astype(jnp.int32)
    i0 = jnp.minimum(i0, in_size - 1)
    i1 = jnp.minimum(i0 + 1, in_size - 1)
    w1 = jnp.clip(src - i0.astype(jnp.float32), 0.0, 1.0)
    w0 = 1.0 - w1
    rows = jnp.arange(out_size)
    m = jnp.zeros((out_size, in_size), jnp.float32)
    m = m.at[rows, i0].add(w0)
    m = m.at[rows, i1].add(w1)
    return m


# ----------------------------------------------------------------------------
# VMEM budgeting
# ----------------------------------------------------------------------------
def _vmem_capacity_bytes() -> int:
    try:
        return int(pltpu.get_tpu_info().vmem_capacity_bytes)
    except Exception:
        return 64 * 1024 * 1024  # conservative: v7x per-TC physical VMEM


def _round_up(x: int, m: int) -> int:
    return -(-x // m) * m


def _padded_elems(rows: int, cols: int, dtype) -> int:
    """Element count of a (rows, cols) slab after (sublane, 128) tiling."""
    itemsize = jnp.dtype(dtype).itemsize
    sublane = 8 * max(1, 4 // itemsize)  # 8 for f32, 16 for bf16, 32 for int8
    return _round_up(max(rows, 1), sublane) * _round_up(max(cols, 1), 128)


def _block_need_bytes(b, h_in, h_out, w_in, w_out, dtype) -> int:
    itemsize = jnp.dtype(dtype).itemsize
    need = 2 * b * _padded_elems(h_in, w_in, dtype) * itemsize       # input block (dbl-buffered)
    need += 2 * b * _padded_elems(h_out, w_out, dtype) * itemsize    # output block (dbl-buffered)
    need += 2 * _padded_elems(h_out, h_in, jnp.float32) * 4          # Wh block
    need += 2 * _padded_elems(w_in, w_out, jnp.float32) * 4          # Ww^T block
    need += _padded_elems(b * h_out, w_in, jnp.float32) * 4          # f32 H-resize scratch
    need += _padded_elems(b * h_out, w_out, jnp.float32) * 4         # f32 W-matmul result
    return need


def _choose_plane_batch(nc, h_in, h_out, w_in, w_out, dtype, budget, max_bsz=256) -> int:
    """Largest divisor of nc that fits the VMEM budget, preferring >= 2 grid
    steps (software pipelining / v7x dual-TC). Fallback bsz=1 is always legal
    with the 3-D block layout."""
    best_key, best_b = None, 1
    for b in range(1, min(nc, max_bsz) + 1):
        if nc % b:
            continue
        if _block_need_bytes(b, h_in, h_out, w_in, w_out, dtype) > budget:
            continue
        key = (nc // b >= 2, b)
        if best_key is None or key > best_key:
            best_key, best_b = key, b
    return best_b


# ----------------------------------------------------------------------------
# Kernel
# ----------------------------------------------------------------------------
def _upsample_kernel(x_ref, wh_ref, wwt_ref, o_ref, t_ref, *, bsz, h_out):
    # x_ref:   (bsz, H_in, W_in)   batch of input planes
    # wh_ref:  (H_out, H_in)       H-interpolation matrix (f32)
    # wwt_ref: (W_in, W_out)       W-interpolation matrix, pre-transposed (f32)
    # o_ref:   (bsz, H_out, W_out)
    # t_ref:   (bsz*H_out, W_in)   f32 VMEM scratch for the H-resized intermediate
    wh = wh_ref[...]

    if bsz <= 16:
        # Short, fixed trip count: unroll statically.
        for b in range(bsz):
            t_ref[b * h_out:(b + 1) * h_out, :] = jnp.dot(
                wh, x_ref[b], preferred_element_type=jnp.float32)
    else:
        def body(b, carry):
            start = b * h_out
            if h_out % 8 == 0:
                start = pl.multiple_of(start, 8)
            t_ref[pl.ds(start, h_out), :] = jnp.dot(
                wh, x_ref[b], preferred_element_type=jnp.float32)
            return carry
        lax.fori_loop(0, bsz, body, 0)

    # W-resize: one lane-contiguous matmul over the whole plane batch, fed
    # directly from the f32 scratch (no concatenate / extra copy).
    out = jnp.dot(t_ref[...], wwt_ref[...], preferred_element_type=jnp.float32)
    o_ref[...] = out.reshape(o_ref.shape).astype(o_ref.dtype)


# ----------------------------------------------------------------------------
# Wrapper
# ----------------------------------------------------------------------------
@functools.partial(jax.jit, static_argnames=("scale_factor",))
def upsample_bilinear(x: jnp.ndarray, scale_factor) -> jnp.ndarray:
    """x: (N, C, H, W) -> (N, C, floor(H*sf), floor(W*sf)), bilinear, align_corners=False."""
    n, c, h_in, w_in = x.shape
    h_out = int(math.floor(h_in * float(scale_factor)))
    w_out = int(math.floor(w_in * float(scale_factor)))
    nc = n * c
    itemsize = jnp.dtype(x.dtype).itemsize

    # f32 interp weights + f32 intermediate end-to-end (matches PyTorch's fp32
    # accumulation); only the final store casts back to x.dtype.
    wh = _build_interp_matrix(h_out, h_in, scale_factor)       # (H_out, H_in)  f32
    wwt = _build_interp_matrix(w_out, w_in, scale_factor).T    # (W_in, W_out)  f32

    # Generation-aware VMEM budget.
    cap = _vmem_capacity_bytes()
    vmem_limit = int(max(32 << 20, min((cap * 3) // 4, 96 << 20)))
    budget = max(vmem_limit - (8 << 20), 16 << 20)

    bsz = _choose_plane_batch(nc, h_in, h_out, w_in, w_out, x.dtype, budget)
    grid = (nc // bsz,)

    # Free view: planes along the leading axis -> block dims over H/W span the
    # full extents, so bsz is never alignment-constrained.
    x3d = x.reshape(nc, h_in, w_in)

    flops = 2 * nc * (h_out * h_in * w_in + h_out * w_in * w_out)
    bytes_accessed = (nc * (h_in * w_in + h_out * w_out) * itemsize
                      + (h_out * h_in + w_in * w_out) * 4)

    out3d = pl.pallas_call(
        functools.partial(_upsample_kernel, bsz=bsz, h_out=h_out),
        out_shape=jax.ShapeDtypeStruct((nc, h_out, w_out), x.dtype),
        grid_spec=pltpu.PrefetchScalarGridSpec(
            num_scalar_prefetch=0,
            grid=grid,
            in_specs=[
                pl.BlockSpec((bsz, h_in, w_in), lambda i: (i, 0, 0)),
                pl.BlockSpec((h_out, h_in), lambda i: (0, 0)),
                pl.BlockSpec((w_in, w_out), lambda i: (0, 0)),
            ],
            out_specs=pl.BlockSpec((bsz, h_out, w_out), lambda i: (i, 0, 0)),
            scratch_shapes=[pltpu.VMEM((bsz * h_out, w_in), jnp.float32)],
        ),
        compiler_params=pltpu.CompilerParams(
            dimension_semantics=("parallel",),
            vmem_limit_bytes=vmem_limit,
        ),
        cost_estimate=pl.CostEstimate(
            flops=flops, transcendentals=0, bytes_accessed=bytes_accessed),
    )(x3d, wh, wwt)

    return out3d.reshape(n, c, h_out, w_out)


# ----------------------------------------------------------------------------
# Reference (independent gather/lerp implementation of PyTorch semantics)
# ----------------------------------------------------------------------------
def _reference_bilinear(x: jnp.ndarray, scale_factor) -> jnp.ndarray:
    n, c, h_in, w_in = x.shape
    h_out = int(math.floor(h_in * float(scale_factor)))
    w_out = int(math.floor(w_in * float(scale_factor)))

    def coords(out_size, in_size):
        src = (jnp.arange(out_size, dtype=jnp.float32) + 0.5) / float(scale_factor) - 0.5
        src = jnp.maximum(src, 0.0)
        i0 = jnp.minimum(jnp.floor(src).astype(jnp.int32), in_size - 1)
        i1 = jnp.minimum(i0 + 1, in_size - 1)
        lam = jnp.clip(src - i0.astype(jnp.float32), 0.0, 1.0)
        return i0, i1, 1.0 - lam, lam

    h0, h1, a0, a1 = coords(h_out, h_in)
    w0, w1, b0, b1 = coords(w_out, w_in)
    xf = x.astype(jnp.float32)
    top = (xf[:, :, h0, :] * a0[None, None, :, None]
           + xf[:, :, h1, :] * a1[None, None, :, None])           # (n, c, h_out, w_in)
    out = top[:, :, :, w0] * b0 + top[:, :, :, w1] * b1           # (n, c, h_out, w_out)
    return out.astype(x.dtype)


if __name__ == "__main__":
    key = jax.random.PRNGKey(0)
    # Module has no learned parameters; only scale_factor from __init__.
    scale_factor = 2
    x = jax.random.normal(key, (2, 4, 16, 16), dtype=jnp.float32)

    y = jax.block_until_ready(upsample_bilinear(x, scale_factor))

    y_ref = _reference_bilinear(x, scale_factor)
    assert y.shape == (2, 4, 32, 32)
    assert jnp.allclose(y, y_ref, atol=1e-4, rtol=1e-4), float(jnp.max(jnp.abs(y - y_ref)))

    print("KERNEL_OK")
</pallas_src>

<mosaic_0001>
module attributes {stable_mosaic.version = 11 : i64} {
  func.func @_upsample_kernel(%arg0: i32, %arg1: memref<4x16x16xf32, #tpu.memory_space<vmem>>, %arg2: memref<32x16xf32, #tpu.memory_space<vmem>>, %arg3: memref<16x32xf32, #tpu.memory_space<vmem>>, %arg4: memref<4x32x32xf32, #tpu.memory_space<vmem>>, %arg5: memref<128x16xf32, #tpu.memory_space<vmem>>) attributes {dimension_semantics = [#tpu.dimension_semantics<parallel>], iteration_bounds = array<i64: 2>, scalar_prefetch = 0 : i64, scratch_operands = 1 : i64, tpu.core_type = #tpu.core_type<tc>, window_params = [{transform_indices = @transform_0, window_bounds = array<i64: 4, 16, 16>}, {pipeline_mode = #tpu.pipeline_mode<synchronous>, transform_indices = @transform_1, window_bounds = array<i64: 32, 16>}, {pipeline_mode = #tpu.pipeline_mode<synchronous>, transform_indices = @transform_2, window_bounds = array<i64: 16, 32>}, {transform_indices = @transform_3, window_bounds = array<i64: 4, 32, 32>}]} {
    %c0 = arith.constant 0 : index
    %c0_0 = arith.constant 0 : index
    %0 = vector.load %arg2[%c0, %c0_0] : memref<32x16xf32, #tpu.memory_space<vmem>>, vector<32x16xf32>
    %c0_1 = arith.constant 0 : index
    %c0_2 = arith.constant 0 : index
    %c0_3 = arith.constant 0 : index
    %1 = vector.load %arg1[%c0_1, %c0_2, %c0_3] : memref<4x16x16xf32, #tpu.memory_space<vmem>>, vector<1x16x16xf32>
    %2 = vector.shape_cast %1 : vector<1x16x16xf32> to vector<16x16xf32>
    %cst = arith.constant dense<0.000000e+00> : vector<32x16xf32>
    %3 = tpu.matmul %0, %2, %cst {dimension_numbers = #tpu.dot_dimension_numbers<[1], [0], [0], [1], [0, 0, 1, 1], [], []>} : vector<32x16xf32>, vector<16x16xf32>, vector<32x16xf32> -> vector<32x16xf32>
    %c0_4 = arith.constant 0 : index
    %c0_5 = arith.constant 0 : index
    %4 = vector.load %arg5[%c0_4, %c0_5] : memref<128x16xf32, #tpu.memory_space<vmem>>, vector<32x16xf32>
    tpu.vector_store %arg5[%c0_4, %c0_5], %3 {strides = array<i32>} : memref<128x16xf32, #tpu.memory_space<vmem>>, vector<32x16xf32>,
    %c1 = arith.constant 1 : index
    %c0_6 = arith.constant 0 : index
    %c0_7 = arith.constant 0 : index
    %5 = vector.load %arg1[%c1, %c0_6, %c0_7] : memref<4x16x16xf32, #tpu.memory_space<vmem>>, vector<1x16x16xf32>
    %6 = vector.shape_cast %5 : vector<1x16x16xf32> to vector<16x16xf32>
    %cst_8 = arith.constant dense<0.000000e+00> : vector<32x16xf32>
    %7 = tpu.matmul %0, %6, %cst_8 {dimension_numbers = #tpu.dot_dimension_numbers<[1], [0], [0], [1], [0, 0, 1, 1], [], []>} : vector<32x16xf32>, vector<16x16xf32>, vector<32x16xf32> -> vector<32x16xf32>
    %c32 = arith.constant 32 : index
    %c0_9 = arith.constant 0 : index
    %8 = vector.load %arg5[%c32, %c0_9] : memref<128x16xf32, #tpu.memory_space<vmem>>, vector<32x16xf32>
    tpu.vector_store %arg5[%c32, %c0_9], %7 {strides = array<i32>} : memref<128x16xf32, #tpu.memory_space<vmem>>, vector<32x16xf32>,
    %c2 = arith.constant 2 : index
    %c0_10 = arith.constant 0 : index
    %c0_11 = arith.constant 0 : index
    %9 = vector.load %arg1[%c2, %c0_10, %c0_11] : memref<4x16x16xf32, #tpu.memory_space<vmem>>, vector<1x16x16xf32>
    %10 = vector.shape_cast %9 : vector<1x16x16xf32> to vector<16x16xf32>
    %cst_12 = arith.constant dense<0.000000e+00> : vector<32x16xf32>
    %11 = tpu.matmul %0, %10, %cst_12 {dimension_numbers = #tpu.dot_dimension_numbers<[1], [0], [0], [1], [0, 0, 1, 1], [], []>} : vector<32x16xf32>, vector<16x16xf32>, vector<32x16xf32> -> vector<32x16xf32>
    %c64 = arith.constant 64 : index
    %c0_13 = arith.constant 0 : index
    %12 = vector.load %arg5[%c64, %c0_13] : memref<128x16xf32, #tpu.memory_space<vmem>>, vector<32x16xf32>
    tpu.vector_store %arg5[%c64, %c0_13], %11 {strides = array<i32>} : memref<128x16xf32, #tpu.memory_space<vmem>>, vector<32x16xf32>,
    %c3 = arith.constant 3 : index
    %c0_14 = arith.constant 0 : index
    %c0_15 = arith.constant 0 : index
    %13 = vector.load %arg1[%c3, %c0_14, %c0_15] : memref<4x16x16xf32, #tpu.memory_space<vmem>>, vector<1x16x16xf32>
    %14 = vector.shape_cast %13 : vector<1x16x16xf32> to vector<16x16xf32>
    %cst_16 = arith.constant dense<0.000000e+00> : vector<32x16xf32>
    %15 = tpu.matmul %0, %14, %cst_16 {dimension_numbers = #tpu.dot_dimension_numbers<[1], [0], [0], [1], [0, 0, 1, 1], [], []>} : vector<32x16xf32>, vector<16x16xf32>, vector<32x16xf32> -> vector<32x16xf32>
    %c96 = arith.constant 96 : index
    %c0_17 = arith.constant 0 : index
    %16 = vector.load %arg5[%c96, %c0_17] : memref<128x16xf32, #tpu.memory_space<vmem>>, vector<32x16xf32>
    tpu.vector_store %arg5[%c96, %c0_17], %15 {strides = array<i32>} : memref<128x16xf32, #tpu.memory_space<vmem>>, vector<32x16xf32>,
    %c0_18 = arith.constant 0 : index
    %c0_19 = arith.constant 0 : index
    %17 = vector.load %arg5[%c0_18, %c0_19] : memref<128x16xf32, #tpu.memory_space<vmem>>, vector<128x16xf32>
    %c0_20 = arith.constant 0 : index
    %c0_21 = arith.constant 0 : index
    %18 = vector.load %arg3[%c0_20, %c0_21] : memref<16x32xf32, #tpu.memory_space<vmem>>, vector<16x32xf32>
    %cst_22 = arith.constant dense<0.000000e+00> : vector<128x32xf32>
    %19 = tpu.matmul %17, %18, %cst_22 {dimension_numbers = #tpu.dot_dimension_numbers<[1], [0], [0], [1], [0, 0, 1, 1], [], []>} : vector<128x16xf32>, vector<16x32xf32>, vector<128x32xf32> -> vector<128x32xf32>
    %20 = vector.shape_cast %19 : vector<128x32xf32> to vector<4x32x32xf32>
    %c0_23 = arith.constant 0 : index
    %c0_24 = arith.constant 0 : index
    %c0_25 = arith.constant 0 : index
    %21 = vector.load %arg4[%c0_23, %c0_24, %c0_25] : memref<4x32x32xf32, #tpu.memory_space<vmem>>, vector<4x32x32xf32>
    tpu.vector_store %arg4[%c0_23, %c0_24, %c0_25], %20 {strides = array<i32>} : memref<4x32x32xf32, #tpu.memory_space<vmem>>, vector<4x32x32xf32>,
    return
  }
  func.func @transform_0(%arg0: i32) -> (i32, i32, i32) {
    %c0_i32 = arith.constant 0 : i32
    %c0_i32_0 = arith.constant 0 : i32
    %c0_i32_1 = arith.constant 0 : i32
    return %arg0, %c0_i32, %c0_i32_0 : i32, i32, i32
  }
  func.func @transform_1(%arg0: i32) -> (i32, i32) {
    %c0_i32 = arith.constant 0 : i32
    %c0_i32_0 = arith.constant 0 : i32
    %c0_i32_1 = arith.constant 0 : i32
    return %c0_i32, %c0_i32_0 : i32, i32
  }
  func.func @transform_2(%arg0: i32) -> (i32, i32) {
    %c0_i32 = arith.constant 0 : i32
    %c0_i32_0 = arith.constant 0 : i32
    %c0_i32_1 = arith.constant 0 : i32
    return %c0_i32, %c0_i32_0 : i32, i32
  }
  func.func @transform_3(%arg0: i32) -> (i32, i32, i32) {
    %c0_i32 = arith.constant 0 : i32
    %c0_i32_0 = arith.constant 0 : i32
    %c0_i32_1 = arith.constant 0 : i32
    return %arg0, %c0_i32, %c0_i32_0 : i32, i32, i32
  }
}

</mosaic_0001>

<bundles_post_ra>
// kernel: upsample_bilinear.1
= control target key start
LH: loop header
LB: loop body
LE: loop exit
PB: predicated region body
PF: predicated region fallthrough
CT: control target
= control target key end

     0   :  { %8 = vsyncpa [#allocation4], 0  ;;  %s935_s0 = inlined_call_operand.vmem [shape: f32[8,16,16], index: 0, kind: input, shape index: {}]   ;;  %s936_s1 = inlined_call_operand.vmem [shape: f32[32,16], index: 1, kind: input, shape index: {}]   ;;  %s937_s2 = inlined_call_operand.vmem [shape: f32[16,32], index: 2, kind: input, shape index: {}]   ;;  %s938_s3 = inlined_call_operand.hbm [shape: f32[8,32,32], index: 3, kind: output, shape index: {}]  }
   0x1   :  { %10 = vsyncpa [#allocation4 + $0x1], 0  ;;  %s746_s12 = smov 0   ;;  %s748_s13 = smov 0  }
   0x2   :  { %s750_s14 = smov 0   ;;  %s752_s15 = smov 0  }
   0x3 LB: > { %s767_s16 = sadd.s32 4294967295, %s722_s15   ;;  %s562_s17 = sadd.s32 4294967294, %s722_s15   ;;  %s722_s15 = sphi %s752_s15, %s944_s15   ;;  %s718_s14 = sphi %s750_s14, %s943_s14   ;;  %s714_s13 = sphi %s748_s13, %s942_s13   ;;  %s710_s12 = sphi %s746_s12, %s941_s12  }
   0x4   : > { %s771_s18 = sadd.s32 1, %s722_s15   ;;  %s91_s19 = sadd.s32 1, %s718_s14 }
   0x5   : > { %s88_s20 = ssub.s32 %s722_s15, %s771_s18  ;;  %p101_p0 = scmp.ne.s32.totalorder %s718_s14, %s714_s13 }
   0x6   : > { %p89_p1 = scmp.eq.s32.totalorder %s88_s20, 0  ;;  %p102_p2 = scmp.eq.s32.totalorder %s767_s16, 1 }
   0x7   : > { %p107_p3 = scmp.ne.s32.totalorder %s714_s13, %s710_s12  ;;  %p108_p4 = scmp.eq.s32.totalorder %s562_s17, 1 }
   0x8   : > { %s782_s21 = scalar_select %p89_p1, %s718_s14, %s91_s19  }
   0x9   : > { %p784_p5 = por %p102_p2, %p101_p0  ;;  %p788_p6 = por %p108_p4, %p107_p3 }
   0xa   : > { %p565_p7 = scmp.ge.s32.totalorder %s722_s15, 1  ;;  %p142_p8 = scmp.lt.s32.totalorder %s722_s15, 3 }
   0xc   : > { %p143_p9 = pnand %p565_p7, %p142_p8 }
   0xd   : > { %s567_s24 = sshll.u32 (!%p143_p9), %s767_s16, 2  ;;  %s164_s20 = sand.u32 (!%p143_p9), 1, %s714_s13  }
   0xe   : > { %146 = sbr.rel (%p143_p9) target bundleno = 358 (0x166), region = 32  ;;  %p168_p10 = scmp.lt.s32.totalorder (!%p143_p9), %s567_s24, 7 }
   0xf   : > { %s616_s26 = sshll.u32 (!%p143_p9), %s767_s16, 7  ;;  %s484_s5 = scalar_lea.sflag (!%p143_p9), [#allocation4], %s164_s20 }
  0x10   : > { %s496_s29 = scalar_lea.hbm (!%p143_p9), %s938_s3, %s616_s26  ;;  %s680_s9 = scalar_lea.hbm (!%p143_p9), %s938_s3, 256 }
  0x11   : > { %s499_s4 = sshll.u32 (!%p143_p9), %s496_s29, 4  ;;  %s500_s4 = int_to_ptr.hbm [resolvable:$true] %s499_s4 }
  0x12   : > { %s674_s16 = sshra.s32 (!%p143_p9), %s500_s4, 4  ;;  %s675_s16 = int_to_ptr.hbm [resolvable:$true] %s674_s16 }
  0x13   : > { %s946_s24 = smov (!%p168_p10, %s567_s24), 7  ;;  %v175_v2 = vld [vmem:[%s936_s1] sm:$0xff]  ;;  %vm181_vm0 = vcmask 130048   ;;  %v176_v9 = vld [vmem:[%s936_s1 + $0x8] sm:$0xff]  ;;  %v177_v10 = vld [vmem:[%s936_s1 + $0x10] sm:$0xff]  ;;  %vm466_vm1 = vcmask 261120   ;;  %p681_p0 = scmp.lt.s32.totalorder %s675_s16, %s938_s3 }
  0x14   : > { %s614_s25 = sshll.u32 %s946_s24, 4  ;;  %v178_v11 = vld [vmem:[%s936_s1 + $0x18] sm:$0xff]  ;;  %v352_v12 = vld [vmem:[%s937_s2 + $0x8] sm:$0xff]  ;;  %v351_v13 = vld [vmem:[%s937_s2] sm:$0xff]  ;;  %s566_s24 = sshll.u32 %s164_s20, 7 }
  0x15   : > { %s172_s28 = scalar_lea.vmem %s935_s0, %s614_s25  ;;  %617 = vmatpush.msra.mxu2 %v352_v12  ;;  %415 = vmatpush.msra.mxu0 %v352_v12  ;;  %s867_s25 = scalar_lea.vmem [#allocation3], %s566_s24 }
  0x16   : > { %v581_v0 = vld [vmem:[%s172_s28 + $0x28] sm:$0xff]  ;;  %v580_v1 = vld [vmem:[%s172_s28 + $0x20] sm:$0xff]  ;;  %v587_v5 = vld [vmem:[%s172_s28 + $0x38] sm:$0xff]  ;;  %s497_s30 = sshll.u32 %s867_s25, 4  ;;  %s676_s6 = scalar_lea.hbm %s675_s16, 128  ;;  %s498_s30 = int_to_ptr.vmem [resolvable:$true] %s497_s30 }
  0x17   : > { %280 = vmatpush.msra.mxu3 %v581_v0  ;;  %v180_v3 = vld [vmem:[%s172_s28 + $0x8] sm:$0xff]  ;;  %v179_v4 = vld [vmem:[%s172_s28] sm:$0xff]  ;;  %v575_v6 = vld [vmem:[%s172_s28 + $0x18] sm:$0xff]  ;;  %618 = vmatpush.msra.mxu2 %v351_v13  ;;  %p677_p11 = scmp.ne.s32.totalorder %s675_s16, %s676_s6  ;;  %p682_p1 = scmp.lt.s32.totalorder %s680_s9, %s676_s6 }
  0x18   : > { %208 = vmatpush.msra.mxu1 %v180_v3  ;;  %v586_v7 = vld [vmem:[%s172_s28 + $0x30] sm:$0xff]  ;;  %416 = vmatpush.msra.mxu0 %v351_v13 }
  0x19   : > { %281 = vmatpush.msra.mxu3 %v580_v1  ;;  %v574_v8 = vld [vmem:[%s172_s28 + $0x10] sm:$0xff]  ;;  %p678_p12 = pnand %p677_p11, %p784_p5  ;;  %p683_p2 = por %p682_p1, %p681_p0 }
  0x1a   : > { %582 = vmatmul.msk.f32.vlgmr.msra.gmra.mxu3 %vm181_vm0, %v175_v2  ;;  %209 = vmatpush.msra.mxu1 %v179_v4 }
  0x1b   : > { %316 = vmatpush.msrb.mxu3 %v587_v5  ;;  %570 = vmatmul.msk.f32.vlgmr.msra.gmra.mxu1 %vm181_vm0, %v175_v2  ;;  %p679_p13 = pneg %p678_p12 }
  0x1c   : > { %244 = vmatpush.msrb.mxu1 %v575_v6 }
  0x1d   : > { %317 = vmatpush.msrb.mxu3 %v586_v7  ;;  %p684_p3 = pnand %p683_p2, %p679_p13 }
  0x1e   : > { %245 = vmatpush.msrb.mxu1 %v574_v8 }
  0x22   : > { %583 = vmatmul.msk.f32.gmra.mxu3 %vm181_vm0, %v176_v9 }
  0x23   : > { %571 = vmatmul.msk.f32.gmra.mxu1 %vm181_vm0, %v176_v9 }
  0x2a   : > { %584 = vmatmul.msk.f32.gmra.mxu3 %vm181_vm0, %v177_v10 }
  0x2b   : > { %572 = vmatmul.msk.f32.gmra.mxu1 %vm181_vm0, %v177_v10 }
  0x32   : > { %585 = vmatmul.msk.f32.gmra.mxu3 %vm181_vm0, %v178_v11 }
  0x33   : > { %573 = vmatmul.msk.f32.gmra.mxu1 %vm181_vm0, %v178_v11 }
  0x3a   : > { %588 = vmatmul.msk.f32.vlgmr.msrb.gmra.mxu3 %vm181_vm0, %v175_v2 }
  0x3b   : > { %576 = vmatmul.msk.f32.vlgmr.msrb.gmra.mxu1 %vm181_vm0, %v175_v2 }
  0x42   : > { %589 = vmatmul.msk.f32.gmra.mxu3 %vm181_vm0, %v176_v9 }
  0x43   : > { %577 = vmatmul.msk.f32.gmra.mxu1 %vm181_vm0, %v176_v9 }
  0x4a   : > { %590 = vmatmul.msk.f32.gmra.mxu3 %vm181_vm0, %v177_v10 }
  0x4b   : > { %578 = vmatmul.msk.f32.gmra.mxu1 %vm181_vm0, %v177_v10 }
  0x52   : > { %591 = vmatmul.msk.f32.gmra.mxu3 %vm181_vm0, %v178_v11 }
  0x53   : > { %579 = vmatmul.msk.f32.gmra.mxu1 %vm181_vm0, %v178_v11 }
  0x98   : > { %v211_v14 = vpop.f32.mrf.mxu1 }
  0x99   : > { %223 = vst.msk [vmem:[#allocation2] sm:$0xff] %vm181_vm0, %v211_v14 }
  0x9d   : > { %v283_v15 = vpop.f32.mrf.mxu3 }
  0x9e   : > { %295 = vst.msk [vmem:[#allocation2 + $0x40] sm:$0xff] %vm181_vm0, %v283_v15 }
  0xa0   : > { %v214_v16 = vpop.f32.mrf.mxu1  ;;  %v335_v17 = vld [vmem:[#allocation2] sm:$0xff] }
  0xa1   : > { %224 = vst.msk [vmem:[#allocation2 + $0x8] sm:$0xff] %vm181_vm0, %v214_v16  ;;  %592 = vmatmul.msk.f32.vlgmr.msra.gmra.mxu0 %vm181_vm0, %v335_v17 }
  0xa5   : > { %v286_v18 = vpop.f32.mrf.mxu3  ;;  %v343_v19 = vld [vmem:[#allocation2 + $0x40] sm:$0xff] }
  0xa6   : > { %296 = vst.msk [vmem:[#allocation2 + $0x48] sm:$0xff] %vm181_vm0, %v286_v18  ;;  %600 = vmatmul.msk.f32.vlgmr.msra.gmra.mxu2 %vm181_vm0, %v343_v19 }
  0xa8   : > { %v217_v20 = vpop.f32.mrf.mxu1  ;;  %v336_v21 = vld [vmem:[#allocation2 + $0x8] sm:$0xff] }
  0xa9   : > { %225 = vst.msk [vmem:[#allocation2 + $0x10] sm:$0xff] %vm181_vm0, %v217_v20  ;;  %593 = vmatmul.msk.f32.gmra.mxu0 %vm181_vm0, %v336_v21 }
  0xad   : > { %v289_v22 = vpop.f32.mrf.mxu3  ;;  %v344_v23 = vld [vmem:[#allocation2 + $0x48] sm:$0xff] }
  0xae   : > { %297 = vst.msk [vmem:[#allocation2 + $0x50] sm:$0xff] %vm181_vm0, %v289_v22  ;;  %601 = vmatmul.msk.f32.gmra.mxu2 %vm181_vm0, %v344_v23 }
  0xb0   : > { %v220_v24 = vpop.f32.mrf.mxu1  ;;  %v337_v25 = vld [vmem:[#allocation2 + $0x10] sm:$0xff] }
  0xb1   : > { %226 = vst.msk [vmem:[#allocation2 + $0x18] sm:$0xff] %vm181_vm0, %v220_v24  ;;  %594 = vmatmul.msk.f32.gmra.mxu0 %vm181_vm0, %v337_v25 }
  0xb5   : > { %v292_v26 = vpop.f32.mrf.mxu3  ;;  %v345_v27 = vld [vmem:[#allocation2 + $0x50] sm:$0xff] }
  0xb6   : > { %298 = vst.msk [vmem:[#allocation2 + $0x58] sm:$0xff] %vm181_vm0, %v292_v26  ;;  %602 = vmatmul.msk.f32.gmra.mxu2 %vm181_vm0, %v345_v27 }
  0xb8   : > { %v247_v28 = vpop.f32.mrf.mxu1  ;;  %v338_v29 = vld [vmem:[#allocation2 + $0x18] sm:$0xff] }
  0xb9   : > { %259 = vst.msk [vmem:[#allocation2 + $0x20] sm:$0xff] %vm181_vm0, %v247_v28  ;;  %595 = vmatmul.msk.f32.gmra.mxu0 %vm181_vm0, %v338_v29 }
  0xbd   : > { %v319_v30 = vpop.f32.mrf.mxu3  ;;  %v346_v31 = vld [vmem:[#allocation2 + $0x58] sm:$0xff] }
  0xbe   : > { %331 = vst.msk [vmem:[#allocation2 + $0x60] sm:$0xff] %vm181_vm0, %v319_v30  ;;  %603 = vmatmul.msk.f32.gmra.mxu2 %vm181_vm0, %v346_v31 }
  0xc0   : > { %v250_v32 = vpop.f32.mrf.mxu1  ;;  %v339_v33 = vld [vmem:[#allocation2 + $0x20] sm:$0xff] }
  0xc1   : > { %260 = vst.msk [vmem:[#allocation2 + $0x28] sm:$0xff] %vm181_vm0, %v250_v32  ;;  %596 = vmatmul.msk.f32.gmra.mxu0 %vm181_vm0, %v339_v33 }
  0xc5   : > { %v322_v34 = vpop.f32.mrf.mxu3  ;;  %v347_v35 = vld [vmem:[#allocation2 + $0x60] sm:$0xff] }
  0xc6   : > { %332 = vst.msk [vmem:[#allocation2 + $0x68] sm:$0xff] %vm181_vm0, %v322_v34  ;;  %604 = vmatmul.msk.f32.gmra.mxu2 %vm181_vm0, %v347_v35 }
  0xc8   : > { %v253_v36 = vpop.f32.mrf.mxu1  ;;  %v340_v37 = vld [vmem:[#allocation2 + $0x28] sm:$0xff] }
  0xc9   : > { %261 = vst.msk [vmem:[#allocation2 + $0x30] sm:$0xff] %vm181_vm0, %v253_v36  ;;  %597 = vmatmul.msk.f32.gmra.mxu0 %vm181_vm0, %v340_v37 }
  0xcd   : > { %v325_v38 = vpop.f32.mrf.mxu3  ;;  %v348_v39 = vld [vmem:[#allocation2 + $0x68] sm:$0xff] }
  0xce   : > { %333 = vst.msk [vmem:[#allocation2 + $0x70] sm:$0xff] %vm181_vm0, %v325_v38  ;;  %605 = vmatmul.msk.f32.gmra.mxu2 %vm181_vm0, %v348_v39 }
  0xd0   : > { %v256_v40 = vpop.f32.mrf.mxu1  ;;  %v341_v41 = vld [vmem:[#allocation2 + $0x30] sm:$0xff] }
  0xd1   : > { %262 = vst.msk [vmem:[#allocation2 + $0x38] sm:$0xff] %vm181_vm0, %v256_v40  ;;  %598 = vmatmul.msk.f32.gmra.mxu0 %vm181_vm0, %v341_v41 }
  0xd5   : > { %v328_v42 = vpop.f32.mrf.mxu3  ;;  %v349_v43 = vld [vmem:[#allocation2 + $0x70] sm:$0xff] }
  0xd6   : > { %334 = vst.msk [vmem:[#allocation2 + $0x78] sm:$0xff] %vm181_vm0, %v328_v42  ;;  %606 = vmatmul.msk.f32.gmra.mxu2 %vm181_vm0, %v349_v43 }
  0xd8   : > { %v342_v44 = vld [vmem:[#allocation2 + $0x38] sm:$0xff] }
  0xd9   : > { %599 = vmatmul.msk.f32.gmra.mxu0 %vm181_vm0, %v342_v44 }
  0xdd   : > { %v350_v45 = vld [vmem:[#allocation2 + $0x78] sm:$0xff] }
  0xde   : > { %607 = vmatmul.msk.f32.gmra.mxu2 %vm181_vm0, %v350_v45 }
 0x11e   : > { %v418_v46 = vpop.f32.mrf.mxu0 }
 0x11f   : > { %467 = vst.msk [vmem:[%s867_s25] sm:$0xff] %vm466_vm1, %v418_v46 }
 0x126   : > { %v421_v47 = vpop.f32.mrf.mxu0 }
 0x127   : > { %468 = vst.msk [vmem:[%s867_s25 + $0x8] sm:$0xff] %vm466_vm1, %v421_v47 }
 0x129   : > { %v442_v48 = vpop.f32.mrf.mxu2 }
 0x12a   : > { %475 = vst.msk [vmem:[%s867_s25 + $0x40] sm:$0xff] %vm466_vm1, %v442_v48 }
 0x12e   : > { %v424_v49 = vpop.f32.mrf.mxu0 }
 0x12f   : > { %469 = vst.msk [vmem:[%s867_s25 + $0x10] sm:$0xff] %vm466_vm1, %v424_v49 }
 0x131   : > { %v445_v50 = vpop.f32.mrf.mxu2 }
 0x132   : > { %476 = vst.msk [vmem:[%s867_s25 + $0x48] sm:$0xff] %vm466_vm1, %v445_v50 }
 0x136   : > { %v427_v51 = vpop.f32.mrf.mxu0 }
 0x137   : > { %470 = vst.msk [vmem:[%s867_s25 + $0x18] sm:$0xff] %vm466_vm1, %v427_v51 }
 0x139   : > { %v448_v52 = vpop.f32.mrf.mxu2 }
 0x13a   : > { %477 = vst.msk [vmem:[%s867_s25 + $0x50] sm:$0xff] %vm466_vm1, %v448_v52 }
 0x13e   : > { %v430_v53 = vpop.f32.mrf.mxu0 }
 0x13f   : > { %471 = vst.msk [vmem:[%s867_s25 + $0x20] sm:$0xff] %vm466_vm1, %v430_v53 }
 0x141   : > { %v451_v54 = vpop.f32.mrf.mxu2 }
 0x142   : > { %478 = vst.msk [vmem:[%s867_s25 + $0x58] sm:$0xff] %vm466_vm1, %v451_v54 }
 0x146   : > { %v433_v55 = vpop.f32.mrf.mxu0 }
 0x147   : > { %472 = vst.msk [vmem:[%s867_s25 + $0x28] sm:$0xff] %vm466_vm1, %v433_v55 }
 0x149   : > { %v454_v56 = vpop.f32.mrf.mxu2 }
 0x14a   : > { %479 = vst.msk [vmem:[%s867_s25 + $0x60] sm:$0xff] %vm466_vm1, %v454_v56 }
 0x14e   : > { %v436_v57 = vpop.f32.mrf.mxu0 }
 0x14f   : > { %473 = vst.msk [vmem:[%s867_s25 + $0x30] sm:$0xff] %vm466_vm1, %v436_v57 }
 0x151   : > { %v457_v58 = vpop.f32.mrf.mxu2 }
 0x152   : > { %480 = vst.msk [vmem:[%s867_s25 + $0x68] sm:$0xff] %vm466_vm1, %v457_v58 }
 0x156   : > { %v439_v59 = vpop.f32.mrf.mxu0 }
 0x157   : > { %474 = vst.msk [vmem:[%s867_s25 + $0x38] sm:$0xff] %vm466_vm1, %v439_v59 }
 0x159   : > { %v460_v60 = vpop.f32.mrf.mxu2 }
 0x15a   : > { %481 = vst.msk [vmem:[%s867_s25 + $0x70] sm:$0xff] %vm466_vm1, %v460_v60 }
 0x161   : > { %v463_v61 = vpop.f32.mrf.mxu2 }
 0x162   : > { %482 = vst.msk [vmem:[%s867_s25 + $0x78] sm:$0xff] %vm466_vm1, %v463_v61 }
 0x163   : > { %687 = shalt.err (!%p684_p3)
}
 0x164   : > { %s724_s17 = smov 128   ;;  %s725_s19 = smov 8  }
 0x165   : > { %619 = dma.vmem_to_hbm [thread:$0]  (%p784_p5), %s498_s30, 2048, %s500_s4, %s484_s5, %s724_s17, %s724_s17, %s725_s19  }
 0x166 PF: > { %p625_p4 = scmp.ge.s32.totalorder %s722_s15, 2  ;;  %s514_s20 = sand.u32 1, %s710_s12  }
 0x167   : > { %s515_s24 = scalar_lea.sflag [#allocation4], %s514_s20 }
 0x168   : > { %p622_p7 = pnand %p625_p4, %p788_p6 }
 0x16a   : > { %p623_p8 = pneg %p622_p7 }
 0x16c   : > { %705 = dma.done.wait (%p623_p8), %s515_s24, 2048  }
 0x16d   : > { %707 = vsyncadd (%p623_p8), %s515_s24, 4294965248  ;;  %p13_p9 = scmp.ge.s32.totalorder %s771_s18, 4   ;;  %s941_s12 = smov %s714_s13 }
 0x16e   : > { %s942_s13 = smov %s718_s14  ;;  %s943_s14 = smov %s782_s21 }
 0x16f   : > { %s944_s15 = smov %s771_s18  ;;  %15 = sbr.rel (!%p13_p9) target bundleno = 3 (0x3), region = 70 }
 0x174   :  { %521 = vsyncpa [#allocation4], 1 }
 0x175   :  { %523 = vsyncpa [#allocation4 + $0x1], 1 }

</bundles_post_ra>
